<compile_context>
chip_gen: v7x
topology: tpu7x:2x2x1
jax: 0.10.0
libtpu: 0.0.40
codegen_flags: <defaults>
</compile_context>

<pallas_src>
import math

import jax
import jax.numpy as jnp
from jax.experimental import pallas as pl
from jax.experimental.pallas import tpu as pltpu


def _round_up(x, m):
    return ((x + m - 1) // m) * m


def _pick_tile(dim, max_tile, align, prefer_split=False):
    """Pick a tile size (multiple of `align`, <= max_tile, <= padded dim).

    Prefers candidates whose padding waste is <= 25%, then (if prefer_split)
    candidates that give >= 2 blocks (so the v7x megacore can partition the
    axis), then the largest tile (maximizes reuse / minimizes grid overhead).
    """
    full = _round_up(dim, align)
    hi = max(align, min(_round_up(max_tile, align), full))
    best, best_key = None, None
    for t in range(align, hi + 1, align):
        padded = _round_up(dim, t)
        ok_pad = (padded - dim) * 4 <= dim          # <= 25% padding waste
        nblk = padded // t
        key = (ok_pad, (nblk >= 2) or not prefer_split, t)
        if best_key is None or key > best_key:
            best_key, best = key, t
    return best


def linear_kernel(x_ref, w_ref, b_ref, o_ref):
    # Grid = (N_blocks, M_blocks, K_blocks).  The K (reduction) axis is last
    # and the output block index ignores it, so the f32 output tile stays
    # resident in VMEM across K and doubles as the accumulator (no scratch).
    @pl.when(pl.program_id(2) == 0)
    def _():
        # Initialize the accumulator with the broadcast bias -> no extra
        # finalize read-modify-write pass at the end of the K loop.
        o_ref[...] = jnp.broadcast_to(b_ref[...], o_ref.shape)

    # x tile (tm, tk) @ W^T tile (tk, tn): the RHS minor (lane) dim is the
    # output-feature dim, the contraction runs over its sublane dim -> plain
    # MXU matmul, no on-chip transpose.  f32 accumulation via
    # preferred_element_type even for bf16 inputs.
    o_ref[...] += jnp.dot(
        x_ref[...], w_ref[...], preferred_element_type=jnp.float32
    )


def prepare_linear_params(weight, bias, *, tn=512, tk=None, use_bf16=True):
    """One-time weight/bias layout prep (amortize across calls).

    weight: (out_features, in_features)  PyTorch layout
    bias:   (out_features,)

    Transposes the weight to (in_features, out_features), zero-pads both dims
    to the chosen tile grid, and casts to the MXU-native input dtype.
    """
    out_f, in_f = weight.shape
    in_dtype = jnp.bfloat16 if use_bf16 else jnp.float32
    if tk is None:
        tk = 1024 if use_bf16 else 512   # keep K tiles large (acc-RMW amortization)

    tn_ = _pick_tile(out_f, tn, 128, prefer_split=True)  # lane-dense output tiles
    tk_ = _pick_tile(in_f, tk, 128)
    Np = _round_up(out_f, tn_)
    Kp = _round_up(in_f, tk_)

    w_t = (
        jnp.zeros((Kp, Np), in_dtype)
        .at[:in_f, :out_f]
        .set(weight.T.astype(in_dtype))
    )
    b_p = jnp.zeros((1, Np), jnp.float32).at[:, :out_f].set(bias.astype(jnp.float32))

    return dict(
        w=w_t, b=b_p, in_features=in_f, out_features=out_f,
        tn=tn_, tk=tk_, Np=Np, Kp=Kp, in_dtype=in_dtype,
    )


def my_linear_prepared(x, prep, *, tm=512):
    """Apply the prepared linear layer: y = x @ W^T + b, f32 output."""
    in_f, out_f = prep["in_features"], prep["out_features"]
    tn_, tk_, Np, Kp = prep["tn"], prep["tk"], prep["Np"], prep["Kp"]
    in_dtype = prep["in_dtype"]
    itemsize = jnp.dtype(in_dtype).itemsize

    lead = x.shape[:-1]
    x2 = x.reshape(-1, in_f)
    B = x2.shape[0]

    tm_ = _pick_tile(B, tm, 8)
    Mp = _round_up(B, tm_)

    xp = x2.astype(in_dtype)
    if Mp != B or Kp != in_f:
        xp = jnp.pad(xp, ((0, Mp - B), (0, Kp - in_f)))  # cheap; only x is padded per call

    n_blocks, m_blocks, k_blocks = Np // tn_, Mp // tm_, Kp // tk_
    grid = (n_blocks, m_blocks, k_blocks)   # N leading -> megacore splits the weight

    # Actual streamed bytes: x re-read per N block, W re-read per M block.
    cost = pl.CostEstimate(
        flops=2 * Mp * Kp * Np,
        bytes_accessed=(
            itemsize * (Mp * Kp * n_blocks + Kp * Np * m_blocks)
            + 4 * (Np * m_blocks + Mp * Np)
        ),
        transcendentals=0,
    )

    # Double-buffered x/W/out tiles (+ bias); set the scoped-VMEM limit from
    # the real budget instead of inheriting a per-generation default.
    tile_bytes = (
        2 * (tm_ * tk_ + tk_ * tn_) * itemsize + 2 * tm_ * tn_ * 4 + 2 * tn_ * 4
    )
    vmem_limit = min(64 * 1024 * 1024, max(16 * 1024 * 1024, 2 * tile_bytes))

    out_p = pl.pallas_call(
        linear_kernel,
        out_shape=jax.ShapeDtypeStruct((Mp, Np), jnp.float32),
        grid_spec=pltpu.PrefetchScalarGridSpec(
            num_scalar_prefetch=0,
            grid=grid,
            in_specs=[
                pl.BlockSpec((tm_, tk_), lambda n, m, k: (m, k)),   # x tile
                pl.BlockSpec((tk_, tn_), lambda n, m, k: (k, n)),   # W^T tile (in, out)
                pl.BlockSpec((1, tn_), lambda n, m, k: (0, n)),     # bias tile
            ],
            out_specs=pl.BlockSpec((tm_, tn_), lambda n, m, k: (m, n)),
        ),
        compiler_params=pltpu.CompilerParams(
            dimension_semantics=("parallel", "parallel", "arbitrary"),
            vmem_limit_bytes=vmem_limit,
        ),
        cost_estimate=cost,
    )(xp, prep["w"], prep["b"])

    y = out_p[:B, :out_f]
    return y.reshape(*lead, out_f)


def my_linear(x, weight, bias, *, use_bf16=True, tm=512, tn=512, tk=None):
    """Equivalent of torch.nn.functional.linear(x, weight, bias).

    Convenience wrapper: prepares (transposes/pads/casts) the weight on every
    call.  For repeated use of the same layer, call prepare_linear_params()
    once and reuse it with my_linear_prepared() to avoid the per-call copy.
    """
    prep = prepare_linear_params(weight, bias, tn=tn, tk=tk, use_bf16=use_bf16)
    return my_linear_prepared(x, prep, tm=tm)


def init_my_linear_params(key, in_features, out_features):
    """Deterministic init mirroring MyLinear.reset_parameters():
    kaiming_uniform_(a=sqrt(5)) on weight -> U(-1/sqrt(fan_in), 1/sqrt(fan_in)),
    bias -> U(-1/sqrt(fan_in), 1/sqrt(fan_in)).
    """
    kw, kb = jax.random.split(key)
    fan_in = in_features
    gain = math.sqrt(2.0 / (1.0 + 5.0))          # a = sqrt(5)
    w_bound = gain * math.sqrt(3.0 / fan_in)     # == 1/sqrt(fan_in)
    b_bound = 1.0 / math.sqrt(fan_in)
    weight = jax.random.uniform(
        kw, (out_features, in_features), jnp.float32, -w_bound, w_bound
    )
    bias = jax.random.uniform(kb, (out_features,), jnp.float32, -b_bound, b_bound)
    return weight, bias


if __name__ == "__main__":
    key = jax.random.PRNGKey(0)
    k_x, k_p, k_x2, k_p2 = jax.random.split(key, 4)

    # ---- Small shapes consistent with the module ----
    batch, in_features, out_features = 8, 32, 16
    x = jax.random.normal(k_x, (batch, in_features), jnp.float32)
    weight, bias = init_my_linear_params(k_p, in_features, out_features)
    y_ref = x @ weight.T + bias

    # Bit-exact-ish f32 path.
    y32 = jax.block_until_ready(my_linear(x, weight, bias, use_bf16=False))
    assert y32.shape == (batch, out_features)
    assert jnp.allclose(y32, y_ref, atol=1e-5, rtol=1e-5)

    # Default fast path: bf16 inputs, f32 accumulation (looser tolerance).
    y16 = jax.block_until_ready(my_linear(x, weight, bias))
    assert y16.shape == (batch, out_features)
    assert jnp.allclose(y16, y_ref, atol=3e-2, rtol=3e-2)

    # ---- Larger multi-block path: odd batch (adaptive tm), 2 N blocks
    # (megacore split on the output-feature axis), 2 K accumulation steps. ----
    B2, IN2, OUT2 = 300, 2048, 1024
    x2 = jax.random.normal(k_x2, (B2, IN2), jnp.float32)
    w2, b2 = init_my_linear_params(k_p2, IN2, OUT2)

    prep = prepare_linear_params(w2, b2, use_bf16=True)   # one-time weight prep
    y2 = jax.block_until_ready(my_linear_prepared(x2, prep))

    # Reference with the same bf16 input rounding, f32 math.
    xb = x2.astype(jnp.bfloat16).astype(jnp.float32)
    wb = w2.astype(jnp.bfloat16).astype(jnp.float32)
    y2_ref = jnp.dot(xb, wb.T, precision=jax.lax.Precision.HIGHEST) + b2
    assert y2.shape == (B2, OUT2)
    assert jnp.allclose(y2, y2_ref, atol=1e-2, rtol=1e-2)

    print("KERNEL_OK")
</pallas_src>

<mosaic_0001>
module attributes {stable_mosaic.version = 11 : i64} {
  func.func @linear_kernel(%arg0: i32, %arg1: i32, %arg2: i32, %arg3: memref<8x128xf32, #tpu.memory_space<vmem>>, %arg4: memref<128x128xf32, #tpu.memory_space<vmem>>, %arg5: memref<1x128xf32, #tpu.memory_space<vmem>>, %arg6: memref<8x128xf32, #tpu.memory_space<vmem>>) attributes {dimension_semantics = [#tpu.dimension_semantics<parallel>, #tpu.dimension_semantics<parallel>, #tpu.dimension_semantics<arbitrary>], iteration_bounds = array<i64: 1, 1, 1>, scalar_prefetch = 0 : i64, scratch_operands = 0 : i64, tpu.core_type = #tpu.core_type<tc>, window_params = [{transform_indices = @transform_0, window_bounds = array<i64: 8, 128>}, {transform_indices = @transform_1, window_bounds = array<i64: 128, 128>}, {transform_indices = @transform_2, window_bounds = array<i64: 1, 128>}, {transform_indices = @transform_3, window_bounds = array<i64: 8, 128>}]} {
    %c0_i32 = arith.constant 0 : i32
    %0 = arith.cmpi eq, %arg2, %c0_i32 : i32
    %1 = arith.extui %0 : i1 to i32
    %c0_i32_0 = arith.constant 0 : i32
    %2 = arith.cmpi ne, %1, %c0_i32_0 : i32
    scf.if %2 {
      %c0_8 = arith.constant 0 : index
      %c0_9 = arith.constant 0 : index
      %9 = vector.load %arg5[%c0_8, %c0_9] : memref<1x128xf32, #tpu.memory_space<vmem>>, vector<1x128xf32>
      %10 = vector.shape_cast %9 : vector<1x128xf32> to vector<1x128xf32>
      %11 = vector.broadcast %10 : vector<1x128xf32> to vector<8x128xf32>
      %c0_10 = arith.constant 0 : index
      %c0_11 = arith.constant 0 : index
      %12 = vector.load %arg6[%c0_10, %c0_11] : memref<8x128xf32, #tpu.memory_space<vmem>>, vector<8x128xf32>
      tpu.vector_store %arg6[%c0_10, %c0_11], %11 {strides = array<i32>} : memref<8x128xf32, #tpu.memory_space<vmem>>, vector<8x128xf32>,
    } else {
    }
    %c0 = arith.constant 0 : index
    %c0_1 = arith.constant 0 : index
    %3 = vector.load %arg6[%c0, %c0_1] : memref<8x128xf32, #tpu.memory_space<vmem>>, vector<8x128xf32>
    %c0_2 = arith.constant 0 : index
    %c0_3 = arith.constant 0 : index
    %4 = vector.load %arg3[%c0_2, %c0_3] : memref<8x128xf32, #tpu.memory_space<vmem>>, vector<8x128xf32>
    %c0_4 = arith.constant 0 : index
    %c0_5 = arith.constant 0 : index
    %5 = vector.load %arg4[%c0_4, %c0_5] : memref<128x128xf32, #tpu.memory_space<vmem>>, vector<128x128xf32>
    %cst = arith.constant dense<0.000000e+00> : vector<8x128xf32>
    %6 = tpu.matmul %4, %5, %cst {dimension_numbers = #tpu.dot_dimension_numbers<[1], [0], [0], [1], [0, 0, 1, 1], [], []>} : vector<8x128xf32>, vector<128x128xf32>, vector<8x128xf32> -> vector<8x128xf32>
    %7 = arith.addf %3, %6 : vector<8x128xf32>
    %c0_6 = arith.constant 0 : index
    %c0_7 = arith.constant 0 : index
    %8 = vector.load %arg6[%c0_6, %c0_7] : memref<8x128xf32, #tpu.memory_space<vmem>>, vector<8x128xf32>
    tpu.vector_store %arg6[%c0_6, %c0_7], %7 {strides = array<i32>} : memref<8x128xf32, #tpu.memory_space<vmem>>, vector<8x128xf32>,
    return
  }
  func.func @transform_0(%arg0: i32, %arg1: i32, %arg2: i32) -> (i32, i32) {
    %c0_i32 = arith.constant 0 : i32
    return %arg1, %arg2 : i32, i32
  }
  func.func @transform_1(%arg0: i32, %arg1: i32, %arg2: i32) -> (i32, i32) {
    %c0_i32 = arith.constant 0 : i32
    return %arg2, %arg0 : i32, i32
  }
  func.func @transform_2(%arg0: i32, %arg1: i32, %arg2: i32) -> (i32, i32) {
    %c0_i32 = arith.constant 0 : i32
    %c0_i32_0 = arith.constant 0 : i32
    return %c0_i32, %arg0 : i32, i32
  }
  func.func @transform_3(%arg0: i32, %arg1: i32, %arg2: i32) -> (i32, i32) {
    %c0_i32 = arith.constant 0 : i32
    return %arg1, %arg0 : i32, i32
  }
}

</mosaic_0001>

<bundles_post_ra>
// kernel: tpu_custom_call.1
= control target key start
LH: loop header
LB: loop body
LE: loop exit
PB: predicated region body
PF: predicated region fallthrough
CT: control target
= control target key end

     0   :  { %8 = vsyncpa [#allocation3], 0  ;;  %s390_s0 = inlined_call_operand.hbm [shape: f32[8,128], index: 0, kind: input, shape index: {}]   ;;  %s391_s1 = inlined_call_operand.hbm [shape: f32[128,128], index: 1, kind: input, shape index: {}]   ;;  %s392_s2 = inlined_call_operand.vmem [shape: f32[1,128], index: 2, kind: input, shape index: {}]   ;;  %s393_s3 = inlined_call_operand.hbm [shape: f32[8,128], index: 3, kind: output, shape index: {}]  }
   0x1   :  { %9 = vsyncpa [#allocation6], 0 }
   0x2   :  { %10 = vsyncpa [#allocation4], 0  ;;  %s316_s12 = smov [#allocation2]   ;;  %s317_s14 = smov [#allocation5]  }
   0x3   :  { %s17_s13 = sshll.u32 %s316_s12, 4  ;;  %s26_s15 = sshll.u32 %s317_s14, 4  ;;  %s18_s13 = int_to_ptr.vmem [resolvable:$true] %s17_s13  ;;  %s344_s15 = int_to_ptr.vmem [resolvable:$true] %s26_s15 }
   0x4   :  { %s244_s18 = scalar_lea.hbm %s390_s0, 128 }
   0x5   :  { %p245_p0 = scmp.ne.s32.totalorder %s390_s0, %s244_s18  ;;  %p248_p1 = scmp.lt.u32.totalorder %s244_s18, %s390_s0 }
   0x7   :  { %p250_p2 = pnand %p248_p1, %p245_p0 }
   0x9   :  { %253 = shalt.err (!%p250_p2)
}
   0xa   :  { %s254_s23 = scalar_lea.vmem %s18_s13, 128  ;;  %p259_p4 = scmp.lt.s32.totalorder %s18_s13, %s18_s13 }
   0xb   :  { %p255_p3 = scmp.ne.s32.totalorder %s18_s13, %s254_s23  ;;  %p260_p5 = scmp.lt.s32.totalorder %s254_s23, %s254_s23 }
   0xd   :  { %p261_p6 = por %p260_p5, %p259_p4 }
   0xf   :  { %p262_p7 = pnand %p261_p6, %p255_p3 }
  0x11   :  { %265 = shalt.err (!%p262_p7)
}
  0x12   :  { %20 = dma.hbm_to_vmem [thread:$0]  %s390_s0, 128, %s18_s13, [#allocation3]  }
  0x13   :  { %s266_s28 = scalar_lea.hbm %s391_s1, 2048 }
  0x14   :  { %p267_p8 = scmp.ne.s32.totalorder %s391_s1, %s266_s28  ;;  %p270_p9 = scmp.lt.u32.totalorder %s266_s28, %s391_s1 }
  0x16   :  { %p272_p10 = pnand %p270_p9, %p267_p8 }
  0x18   :  { %275 = shalt.err (!%p272_p10)
}
  0x19   :  { %s276_s6 = scalar_lea.vmem %s344_s15, 2048  ;;  %p281_p12 = scmp.lt.s32.totalorder %s344_s15, %s344_s15 }
  0x1a   :  { %p277_p11 = scmp.ne.s32.totalorder %s344_s15, %s276_s6  ;;  %p282_p13 = scmp.lt.s32.totalorder %s276_s6, %s276_s6 }
  0x1c   :  { %p283_p0 = por %p282_p13, %p281_p12 }
  0x1e   :  { %p284_p1 = pnand %p283_p0, %p277_p11 }
  0x20   :  { %287 = shalt.err (!%p284_p1)
}
  0x21   :  { %s318_s0 = smov 128   ;;  %s319_s7 = smov 8  }
  0x22   :  { %32 = dma.hbm_to_vmem [thread:$0]  %s391_s1, 2048, %s344_s15, [#allocation6], %s318_s0, %s318_s0, %s319_s7  }
  0x23   :  { %310 = dma.done.wait [#allocation3], 128  }
  0x24   :  { %311 = vsyncadd [#allocation3], 4294967168 }
  0x25   :  { %312 = dma.done.wait [#allocation6], 2048  }
  0x26   :  { %313 = vsyncadd [#allocation6], 4294965248  ;;  %v320_v0 = vmov 0.0|0.0   ;;  %vm321_vm0 = vmmov 0   ;;  %v322_v1 = vmov 0.0   ;;  %v55_v2 = vld [vmem:[#allocation5] sm:$0xff] }
  0x27   :  { %212 = vmatprep.subr.bf16.mxu0 %v320_v0  ;;  %209 = vmatprep.mubr.msk.f32.mxu0 %vm321_vm0, %v322_v1  ;;  %v56_v3 = vld [vmem:[#allocation5 + $0x8] sm:$0xff]  ;;  %v57_v4 = vld [vmem:[#allocation5 + $0x10] sm:$0xff]  ;;  %v58_v6 = vld [vmem:[#allocation5 + $0x18] sm:$0xff]  ;;  %s323_s11 = smov [#allocation7]  }
  0x28   :  { %v213_v5 = vpack.c.bf16 %v56_v3, %v55_v2  ;;  %v216_v7 = vpack.c.bf16 %v58_v6, %v57_v4  ;;  %v59_v8 = vld [vmem:[#allocation5 + $0x20] sm:$0xff]  ;;  %v60_v9 = vld [vmem:[#allocation5 + $0x28] sm:$0xff]  ;;  %v61_v11 = vld [vmem:[#allocation5 + $0x30] sm:$0xff]  ;;  %s149_s12 = sshll.u32 %s323_s11, 4  ;;  %s150_s12 = int_to_ptr.vmem [resolvable:$true] %s149_s12 }
  0x29   :  { %v219_v10 = vpack.c.bf16 %v60_v9, %v59_v8  ;;  %v62_v12 = vld [vmem:[#allocation5 + $0x38] sm:$0xff]  ;;  %v63_v14 = vld [vmem:[#allocation5 + $0x40] sm:$0xff]  ;;  %v64_v15 = vld [vmem:[#allocation5 + $0x48] sm:$0xff]  ;;  %s288_s13 = scalar_lea.vmem %s150_s12, 128  ;;  %p293_p3 = scmp.lt.s32.totalorder %s150_s12, %s150_s12 }
  0x2a   :  { %214 = vmatpush3.bf16.msra.mxu0 %v213_v5  ;;  %v222_v13 = vpack.c.bf16 %v62_v12, %v61_v11  ;;  %v225_v16 = vpack.c.bf16 %v64_v15, %v63_v14  ;;  %v65_v17 = vld [vmem:[#allocation5 + $0x50] sm:$0xff]  ;;  %v66_v18 = vld [vmem:[#allocation5 + $0x58] sm:$0xff]  ;;  %v67_v20 = vld [vmem:[#allocation5 + $0x60] sm:$0xff]  ;;  %p289_p2 = scmp.ne.s32.totalorder %s150_s12, %s288_s13  ;;  %p294_p4 = scmp.lt.s32.totalorder %s288_s13, %s288_s13 }
  0x2b   :  { %215 = vmatprep.subr.bf16.mxu0 %v320_v0  ;;  %v228_v19 = vpack.c.bf16 %v66_v18, %v65_v17  ;;  %v68_v21 = vld [vmem:[#allocation5 + $0x68] sm:$0xff]  ;;  %v69_v23 = vld [vmem:[#allocation5 + $0x70] sm:$0xff]  ;;  %v70_v24 = vld [vmem:[#allocation5 + $0x78] sm:$0xff] }
  0x2c   :  { %v231_v22 = vpack.c.bf16 %v68_v21, %v67_v20  ;;  %v234_v25 = vpack.c.bf16 %v70_v24, %v69_v23  ;;  %v54_v26 = vld [vmem:[#allocation2] sm:$0xff]  ;;  %p295_p5 = por %p294_p4, %p293_p3 }
  0x2d   :  { %v159_v27 = vld [vmem:[%s392_s2] ss:$0 sm:$0xff] }
  0x2e   :  { %217 = vmatpush3.bf16.msra.mxu0 %v216_v7  ;;  %p296_p6 = pnand %p295_p5, %p289_p2 }
  0x2f   :  { %218 = vmatprep.subr.bf16.mxu0 %v320_v0 }
  0x32   :  { %220 = vmatpush3.bf16.msra.mxu0 %v219_v10 }
  0x33   :  { %221 = vmatprep.subr.bf16.mxu0 %v320_v0 }
  0x36   :  { %223 = vmatpush3.bf16.msra.mxu0 %v222_v13 }
  0x37   :  { %224 = vmatprep.subr.bf16.mxu0 %v320_v0 }
  0x3a   :  { %226 = vmatpush3.bf16.msra.mxu0 %v225_v16 }
  0x3b   :  { %227 = vmatprep.subr.bf16.mxu0 %v320_v0 }
  0x3e   :  { %229 = vmatpush3.bf16.msra.mxu0 %v228_v19 }
  0x3f   :  { %230 = vmatprep.subr.bf16.mxu0 %v320_v0 }
  0x42   :  { %232 = vmatpush3.bf16.msra.mxu0 %v231_v22 }
  0x43   :  { %233 = vmatprep.subr.bf16.mxu0 %v320_v0 }
  0x46   :  { %235 = vmatpush3.bf16.msra.mxu0 %v234_v25 }
  0x49   :  { %210 = vmatmul.mubr.f32.vlgmr.msra.gmra.mrb[0].mxu0 %v54_v26 }
 0x11c   :  { %v137_v28 = vpop.f32.mrb[0].mxu0 }
 0x11d   :  { %v141_v29 = vadd.f32 %v159_v27, %v137_v28  ;;  %v211_v30 = vpop.f32.mrb[1].mxu0 }
 0x11f   :  { %142 = vst [vmem:[#allocation7] sm:$0xff] %v141_v29 }
 0x120   :  { %299 = shalt.err (!%p296_p6)
}
 0x121   :  { %s300_s16 = scalar_lea.hbm %s393_s3, 128 }
 0x122   :  { %p301_p7 = scmp.ne.s32.totalorder %s393_s3, %s300_s16  ;;  %p304_p8 = scmp.lt.u32.totalorder %s300_s16, %s393_s3 }
 0x124   :  { %p306_p9 = pnand %p304_p8, %p301_p7 }
 0x126   :  { %309 = shalt.err (!%p306_p9)
}
 0x127   :  { %152 = dma.vmem_to_hbm [thread:$0]  %s150_s12, 128, %s393_s3, [#allocation4]  }
 0x128   :  { %314 = dma.done.wait [#allocation4], 128  }
 0x129   :  { %315 = vsyncadd [#allocation4], 4294967168 }
 0x12a   :  { %156 = vsyncpa [#allocation3], 1 }
 0x12b   :  { %157 = vsyncpa [#allocation6], 1 }
 0x12c   :  { %158 = vsyncpa [#allocation4], 1 }

</bundles_post_ra>
